<compile_context>
chip_gen: v5e
topology: v5e:2x2
jax: 0.10.0
libtpu: 0.0.40
codegen_flags: <defaults>
</compile_context>

<pallas_src>
import functools

import jax
import jax.numpy as jnp
from jax.experimental import pallas as pl
from jax.experimental.pallas import tpu as pltpu


def _round_up(x, m):
    return ((x + m - 1) // m) * m


def mlp_kernel(x_ref, w1_ref, b1_ref, w2_ref, b2_ref, o_ref):
    # x_ref : (seq, TB, feat)  f32   -- native layout; permute+reshape fused here
    # w1_ref: (seq, feat, Hp)  bf16  -- fc1 weight, pre-reshaped along seq
    # b1_ref: (1, Hp)          f32
    # w2_ref: (Hp, Op)         bf16
    # b2_ref: (1, Op)          f32
    # o_ref : (TB, Op)         f32
    seq = x_ref.shape[0]

    # fc1: accumulate over the seq axis (== contraction over in_dim = seq*feat).
    # seq is static and small -> unrolled at trace time; each term is one MXU matmul.
    acc = jnp.dot(x_ref[0].astype(jnp.bfloat16), w1_ref[0],
                  preferred_element_type=jnp.float32)
    for s in range(1, seq):
        acc += jnp.dot(x_ref[s].astype(jnp.bfloat16), w1_ref[s],
                       preferred_element_type=jnp.float32)

    h = jnp.maximum(acc + b1_ref[...], 0.0)                      # bias + ReLU in f32
    o = jnp.dot(h.astype(jnp.bfloat16), w2_ref[...],
                preferred_element_type=jnp.float32) + b2_ref[...]
    o_ref[...] = o.astype(o_ref.dtype)


@functools.partial(jax.jit, static_argnames=("batch_tile",))
def multilabel_mlp_forward(x, w1, b1, w2, b2, *, batch_tile=512):
    """x: (seq, batch, feat) f32.  w1: (hidden, in_dim), b1: (hidden,),
    w2: (out_dim, hidden), b2: (out_dim,) -- PyTorch nn.Linear layouts."""
    seq, batch, feat = x.shape
    in_dim = seq * feat
    hidden = w1.shape[0]
    out_dim = w2.shape[0]
    assert w1.shape == (hidden, in_dim) and w2.shape == (out_dim, hidden)

    hidden_p = _round_up(hidden, 128)
    out_p = _round_up(out_dim, 128)

    # Weight re-layout + zero padding (exact) + one-time bf16 cast.
    # w1: (hidden, in_dim) -> (in_dim, hidden) -> (seq, feat, hidden_p)
    # so that w1_3d[s, f, h] == w1.T[s*feat + f, h]  (matches permute+reshape order).
    w1_3d = w1.T.reshape(seq, feat, hidden)
    w1_3d = jnp.pad(w1_3d, ((0, 0), (0, 0), (0, hidden_p - hidden))).astype(jnp.bfloat16)
    b1_p = jnp.pad(b1, (0, hidden_p - hidden)).reshape(1, hidden_p).astype(jnp.float32)
    w2_p = jnp.pad(w2.T, ((0, hidden_p - hidden), (0, out_p - out_dim))).astype(jnp.bfloat16)
    b2_p = jnp.pad(b2, (0, out_p - out_dim)).reshape(1, out_p).astype(jnp.float32)

    # Batch tile: whole batch if small (block == full dim is always legal),
    # otherwise a multiple-of-8 tile; the partial last block is handled by Pallas
    # (garbage rows only feed garbage output rows, which are never written back).
    if batch <= batch_tile:
        tb = batch
    else:
        tb = max(8, (batch_tile // 8) * 8)
    grid = (pl.cdiv(batch, tb),)

    out_padded = pl.pallas_call(
        mlp_kernel,
        out_shape=jax.ShapeDtypeStruct((batch, out_p), x.dtype),
        grid_spec=pltpu.PrefetchScalarGridSpec(
            num_scalar_prefetch=0,
            grid=grid,
            in_specs=[
                pl.BlockSpec((seq, tb, feat), lambda i: (0, i, 0)),        # x tile (pipelined)
                pl.BlockSpec((seq, feat, hidden_p), lambda i: (0, 0, 0)),  # w1 (resident)
                pl.BlockSpec((1, hidden_p), lambda i: (0, 0)),             # b1 (resident)
                pl.BlockSpec((hidden_p, out_p), lambda i: (0, 0)),         # w2 (resident)
                pl.BlockSpec((1, out_p), lambda i: (0, 0)),                # b2 (resident)
            ],
            out_specs=pl.BlockSpec((tb, out_p), lambda i: (i, 0)),
        ),
        compiler_params=pltpu.CompilerParams(
            dimension_semantics=("parallel",)),
    )(x, w1_3d, b1_p, w2_p, b2_p)

    return out_padded[:, :out_dim]


def init_linear(key, in_features, out_features):
    """Deterministic PyTorch-style nn.Linear init: U(-1/sqrt(in), 1/sqrt(in))."""
    kw, kb = jax.random.split(key)
    bound = 1.0 / jnp.sqrt(jnp.float32(in_features))
    w = jax.random.uniform(kw, (out_features, in_features), jnp.float32,
                           minval=-bound, maxval=bound)
    b = jax.random.uniform(kb, (out_features,), jnp.float32,
                           minval=-bound, maxval=bound)
    return w, b


if __name__ == "__main__":
    # Small shapes consistent with the module: x is (seq, batch, feat).
    seq, batch, feat = 8, 2, 32
    hidden_dim, out_dim = 32, 7
    in_dim = seq * feat

    key = jax.random.PRNGKey(0)
    kx, k1, k2 = jax.random.split(key, 3)
    x = jax.random.normal(kx, (seq, batch, feat), jnp.float32)
    w1, b1 = init_linear(k1, in_dim, hidden_dim)     # fc1 (lazily built in torch)
    w2, b2 = init_linear(k2, hidden_dim, out_dim)    # fc2

    out = multilabel_mlp_forward(x, w1, b1, w2, b2)
    out = jax.block_until_ready(out)
    assert out.shape == (batch, out_dim)

    # Reference 1: exact same arithmetic (bf16 operands, f32 accumulation).
    x2d = jnp.transpose(x, (1, 0, 2)).reshape(batch, in_dim)
    h_ref = jnp.maximum(
        jnp.dot(x2d.astype(jnp.bfloat16), w1.T.astype(jnp.bfloat16),
                preferred_element_type=jnp.float32) + b1, 0.0)
    ref_bf16 = jnp.dot(h_ref.astype(jnp.bfloat16), w2.T.astype(jnp.bfloat16),
                       preferred_element_type=jnp.float32) + b2
    assert jnp.allclose(out, ref_bf16, atol=1e-3, rtol=1e-3)

    # Reference 2: full-f32 PyTorch semantics (loose tolerance for bf16 operands).
    ref_f32 = jnp.maximum(x2d @ w1.T + b1, 0.0) @ w2.T + b2
    assert jnp.allclose(out, ref_f32, atol=5e-2, rtol=5e-2)

    print("KERNEL_OK")
</pallas_src>

<mosaic_0001>
module attributes {stable_mosaic.version = 11 : i64} {
  func.func @mlp_kernel(%arg0: i32, %arg1: memref<8x2x32xf32, #tpu.memory_space<vmem>>, %arg2: memref<8x32x128xbf16, #tpu.memory_space<vmem>>, %arg3: memref<1x128xf32, #tpu.memory_space<vmem>>, %arg4: memref<128x128xbf16, #tpu.memory_space<vmem>>, %arg5: memref<1x128xf32, #tpu.memory_space<vmem>>, %arg6: memref<2x128xf32, #tpu.memory_space<vmem>>) attributes {dimension_semantics = [#tpu.dimension_semantics<parallel>], iteration_bounds = array<i64: 1>, scalar_prefetch = 0 : i64, scratch_operands = 0 : i64, tpu.core_type = #tpu.core_type<tc>, window_params = [{transform_indices = @transform_0, window_bounds = array<i64: 8, 2, 32>}, {pipeline_mode = #tpu.pipeline_mode<synchronous>, transform_indices = @transform_1, window_bounds = array<i64: 8, 32, 128>}, {pipeline_mode = #tpu.pipeline_mode<synchronous>, transform_indices = @transform_2, window_bounds = array<i64: 1, 128>}, {pipeline_mode = #tpu.pipeline_mode<synchronous>, transform_indices = @transform_3, window_bounds = array<i64: 128, 128>}, {pipeline_mode = #tpu.pipeline_mode<synchronous>, transform_indices = @transform_4, window_bounds = array<i64: 1, 128>}, {transform_indices = @transform_5, window_bounds = array<i64: 2, 128>}]} {
    %c0 = arith.constant 0 : index
    %c0_0 = arith.constant 0 : index
    %c0_1 = arith.constant 0 : index
    %0 = vector.load %arg1[%c0, %c0_0, %c0_1] : memref<8x2x32xf32, #tpu.memory_space<vmem>>, vector<1x2x32xf32>
    %1 = vector.shape_cast %0 : vector<1x2x32xf32> to vector<2x32xf32>
    %2 = arith.truncf %1 : vector<2x32xf32> to vector<2x32xbf16>
    %c0_2 = arith.constant 0 : index
    %c0_3 = arith.constant 0 : index
    %c0_4 = arith.constant 0 : index
    %3 = vector.load %arg2[%c0_2, %c0_3, %c0_4] : memref<8x32x128xbf16, #tpu.memory_space<vmem>>, vector<1x32x128xbf16>
    %4 = vector.shape_cast %3 : vector<1x32x128xbf16> to vector<32x128xbf16>
    %cst = arith.constant dense<0.000000e+00> : vector<2x128xf32>
    %5 = tpu.matmul %2, %4, %cst {dimension_numbers = #tpu.dot_dimension_numbers<[1], [0], [0], [1], [0, 0, 1, 1], [], []>} : vector<2x32xbf16>, vector<32x128xbf16>, vector<2x128xf32> -> vector<2x128xf32>
    %c1 = arith.constant 1 : index
    %c0_5 = arith.constant 0 : index
    %c0_6 = arith.constant 0 : index
    %6 = vector.load %arg1[%c1, %c0_5, %c0_6] : memref<8x2x32xf32, #tpu.memory_space<vmem>>, vector<1x2x32xf32>
    %7 = vector.shape_cast %6 : vector<1x2x32xf32> to vector<2x32xf32>
    %8 = arith.truncf %7 : vector<2x32xf32> to vector<2x32xbf16>
    %c1_7 = arith.constant 1 : index
    %c0_8 = arith.constant 0 : index
    %c0_9 = arith.constant 0 : index
    %9 = vector.load %arg2[%c1_7, %c0_8, %c0_9] : memref<8x32x128xbf16, #tpu.memory_space<vmem>>, vector<1x32x128xbf16>
    %10 = vector.shape_cast %9 : vector<1x32x128xbf16> to vector<32x128xbf16>
    %cst_10 = arith.constant dense<0.000000e+00> : vector<2x128xf32>
    %11 = tpu.matmul %8, %10, %cst_10 {dimension_numbers = #tpu.dot_dimension_numbers<[1], [0], [0], [1], [0, 0, 1, 1], [], []>} : vector<2x32xbf16>, vector<32x128xbf16>, vector<2x128xf32> -> vector<2x128xf32>
    %12 = arith.addf %5, %11 : vector<2x128xf32>
    %c2 = arith.constant 2 : index
    %c0_11 = arith.constant 0 : index
    %c0_12 = arith.constant 0 : index
    %13 = vector.load %arg1[%c2, %c0_11, %c0_12] : memref<8x2x32xf32, #tpu.memory_space<vmem>>, vector<1x2x32xf32>
    %14 = vector.shape_cast %13 : vector<1x2x32xf32> to vector<2x32xf32>
    %15 = arith.truncf %14 : vector<2x32xf32> to vector<2x32xbf16>
    %c2_13 = arith.constant 2 : index
    %c0_14 = arith.constant 0 : index
    %c0_15 = arith.constant 0 : index
    %16 = vector.load %arg2[%c2_13, %c0_14, %c0_15] : memref<8x32x128xbf16, #tpu.memory_space<vmem>>, vector<1x32x128xbf16>
    %17 = vector.shape_cast %16 : vector<1x32x128xbf16> to vector<32x128xbf16>
    %cst_16 = arith.constant dense<0.000000e+00> : vector<2x128xf32>
    %18 = tpu.matmul %15, %17, %cst_16 {dimension_numbers = #tpu.dot_dimension_numbers<[1], [0], [0], [1], [0, 0, 1, 1], [], []>} : vector<2x32xbf16>, vector<32x128xbf16>, vector<2x128xf32> -> vector<2x128xf32>
    %19 = arith.addf %12, %18 : vector<2x128xf32>
    %c3 = arith.constant 3 : index
    %c0_17 = arith.constant 0 : index
    %c0_18 = arith.constant 0 : index
    %20 = vector.load %arg1[%c3, %c0_17, %c0_18] : memref<8x2x32xf32, #tpu.memory_space<vmem>>, vector<1x2x32xf32>
    %21 = vector.shape_cast %20 : vector<1x2x32xf32> to vector<2x32xf32>
    %22 = arith.truncf %21 : vector<2x32xf32> to vector<2x32xbf16>
    %c3_19 = arith.constant 3 : index
    %c0_20 = arith.constant 0 : index
    %c0_21 = arith.constant 0 : index
    %23 = vector.load %arg2[%c3_19, %c0_20, %c0_21] : memref<8x32x128xbf16, #tpu.memory_space<vmem>>, vector<1x32x128xbf16>
    %24 = vector.shape_cast %23 : vector<1x32x128xbf16> to vector<32x128xbf16>
    %cst_22 = arith.constant dense<0.000000e+00> : vector<2x128xf32>
    %25 = tpu.matmul %22, %24, %cst_22 {dimension_numbers = #tpu.dot_dimension_numbers<[1], [0], [0], [1], [0, 0, 1, 1], [], []>} : vector<2x32xbf16>, vector<32x128xbf16>, vector<2x128xf32> -> vector<2x128xf32>
    %26 = arith.addf %19, %25 : vector<2x128xf32>
    %c4 = arith.constant 4 : index
    %c0_23 = arith.constant 0 : index
    %c0_24 = arith.constant 0 : index
    %27 = vector.load %arg1[%c4, %c0_23, %c0_24] : memref<8x2x32xf32, #tpu.memory_space<vmem>>, vector<1x2x32xf32>
    %28 = vector.shape_cast %27 : vector<1x2x32xf32> to vector<2x32xf32>
    %29 = arith.truncf %28 : vector<2x32xf32> to vector<2x32xbf16>
    %c4_25 = arith.constant 4 : index
    %c0_26 = arith.constant 0 : index
    %c0_27 = arith.constant 0 : index
    %30 = vector.load %arg2[%c4_25, %c0_26, %c0_27] : memref<8x32x128xbf16, #tpu.memory_space<vmem>>, vector<1x32x128xbf16>
    %31 = vector.shape_cast %30 : vector<1x32x128xbf16> to vector<32x128xbf16>
    %cst_28 = arith.constant dense<0.000000e+00> : vector<2x128xf32>
    %32 = tpu.matmul %29, %31, %cst_28 {dimension_numbers = #tpu.dot_dimension_numbers<[1], [0], [0], [1], [0, 0, 1, 1], [], []>} : vector<2x32xbf16>, vector<32x128xbf16>, vector<2x128xf32> -> vector<2x128xf32>
    %33 = arith.addf %26, %32 : vector<2x128xf32>
    %c5 = arith.constant 5 : index
    %c0_29 = arith.constant 0 : index
    %c0_30 = arith.constant 0 : index
    %34 = vector.load %arg1[%c5, %c0_29, %c0_30] : memref<8x2x32xf32, #tpu.memory_space<vmem>>, vector<1x2x32xf32>
    %35 = vector.shape_cast %34 : vector<1x2x32xf32> to vector<2x32xf32>
    %36 = arith.truncf %35 : vector<2x32xf32> to vector<2x32xbf16>
    %c5_31 = arith.constant 5 : index
    %c0_32 = arith.constant 0 : index
    %c0_33 = arith.constant 0 : index
    %37 = vector.load %arg2[%c5_31, %c0_32, %c0_33] : memref<8x32x128xbf16, #tpu.memory_space<vmem>>, vector<1x32x128xbf16>
    %38 = vector.shape_cast %37 : vector<1x32x128xbf16> to vector<32x128xbf16>
    %cst_34 = arith.constant dense<0.000000e+00> : vector<2x128xf32>
    %39 = tpu.matmul %36, %38, %cst_34 {dimension_numbers = #tpu.dot_dimension_numbers<[1], [0], [0], [1], [0, 0, 1, 1], [], []>} : vector<2x32xbf16>, vector<32x128xbf16>, vector<2x128xf32> -> vector<2x128xf32>
    %40 = arith.addf %33, %39 : vector<2x128xf32>
    %c6 = arith.constant 6 : index
    %c0_35 = arith.constant 0 : index
    %c0_36 = arith.constant 0 : index
    %41 = vector.load %arg1[%c6, %c0_35, %c0_36] : memref<8x2x32xf32, #tpu.memory_space<vmem>>, vector<1x2x32xf32>
    %42 = vector.shape_cast %41 : vector<1x2x32xf32> to vector<2x32xf32>
    %43 = arith.truncf %42 : vector<2x32xf32> to vector<2x32xbf16>
    %c6_37 = arith.constant 6 : index
    %c0_38 = arith.constant 0 : index
    %c0_39 = arith.constant 0 : index
    %44 = vector.load %arg2[%c6_37, %c0_38, %c0_39] : memref<8x32x128xbf16, #tpu.memory_space<vmem>>, vector<1x32x128xbf16>
    %45 = vector.shape_cast %44 : vector<1x32x128xbf16> to vector<32x128xbf16>
    %cst_40 = arith.constant dense<0.000000e+00> : vector<2x128xf32>
    %46 = tpu.matmul %43, %45, %cst_40 {dimension_numbers = #tpu.dot_dimension_numbers<[1], [0], [0], [1], [0, 0, 1, 1], [], []>} : vector<2x32xbf16>, vector<32x128xbf16>, vector<2x128xf32> -> vector<2x128xf32>
    %47 = arith.addf %40, %46 : vector<2x128xf32>
    %c7 = arith.constant 7 : index
    %c0_41 = arith.constant 0 : index
    %c0_42 = arith.constant 0 : index
    %48 = vector.load %arg1[%c7, %c0_41, %c0_42] : memref<8x2x32xf32, #tpu.memory_space<vmem>>, vector<1x2x32xf32>
    %49 = vector.shape_cast %48 : vector<1x2x32xf32> to vector<2x32xf32>
    %50 = arith.truncf %49 : vector<2x32xf32> to vector<2x32xbf16>
    %c7_43 = arith.constant 7 : index
    %c0_44 = arith.constant 0 : index
    %c0_45 = arith.constant 0 : index
    %51 = vector.load %arg2[%c7_43, %c0_44, %c0_45] : memref<8x32x128xbf16, #tpu.memory_space<vmem>>, vector<1x32x128xbf16>
    %52 = vector.shape_cast %51 : vector<1x32x128xbf16> to vector<32x128xbf16>
    %cst_46 = arith.constant dense<0.000000e+00> : vector<2x128xf32>
    %53 = tpu.matmul %50, %52, %cst_46 {dimension_numbers = #tpu.dot_dimension_numbers<[1], [0], [0], [1], [0, 0, 1, 1], [], []>} : vector<2x32xbf16>, vector<32x128xbf16>, vector<2x128xf32> -> vector<2x128xf32>
    %54 = arith.addf %47, %53 : vector<2x128xf32>
    %c0_47 = arith.constant 0 : index
    %c0_48 = arith.constant 0 : index
    %55 = vector.load %arg3[%c0_47, %c0_48] : memref<1x128xf32, #tpu.memory_space<vmem>>, vector<1x128xf32>
    %56 = vector.broadcast %55 : vector<1x128xf32> to vector<2x128xf32>
    %57 = arith.addf %54, %56 : vector<2x128xf32>
    %cst_49 = arith.constant 0.000000e+00 : f32
    %58 = vector.broadcast %cst_49 : f32 to vector<2x128xf32>
    %59 = arith.maximumf %57, %58 : vector<2x128xf32>
    %60 = arith.truncf %59 : vector<2x128xf32> to vector<2x128xbf16>
    %c0_50 = arith.constant 0 : index
    %c0_51 = arith.constant 0 : index
    %61 = vector.load %arg4[%c0_50, %c0_51] : memref<128x128xbf16, #tpu.memory_space<vmem>>, vector<128x128xbf16>
    %cst_52 = arith.constant dense<0.000000e+00> : vector<2x128xf32>
    %62 = tpu.matmul %60, %61, %cst_52 {dimension_numbers = #tpu.dot_dimension_numbers<[1], [0], [0], [1], [0, 0, 1, 1], [], []>} : vector<2x128xbf16>, vector<128x128xbf16>, vector<2x128xf32> -> vector<2x128xf32>
    %c0_53 = arith.constant 0 : index
    %c0_54 = arith.constant 0 : index
    %63 = vector.load %arg5[%c0_53, %c0_54] : memref<1x128xf32, #tpu.memory_space<vmem>>, vector<1x128xf32>
    %64 = vector.broadcast %63 : vector<1x128xf32> to vector<2x128xf32>
    %65 = arith.addf %62, %64 : vector<2x128xf32>
    %c0_55 = arith.constant 0 : index
    %c0_56 = arith.constant 0 : index
    %66 = vector.load %arg6[%c0_55, %c0_56] : memref<2x128xf32, #tpu.memory_space<vmem>>, vector<2x128xf32>
    tpu.vector_store %arg6[%c0_55, %c0_56], %65 {strides = array<i32>} : memref<2x128xf32, #tpu.memory_space<vmem>>, vector<2x128xf32>,
    return
  }
  func.func @transform_0(%arg0: i32) -> (i32, i32, i32) {
    %c0_i32 = arith.constant 0 : i32
    %c0_i32_0 = arith.constant 0 : i32
    %c0_i32_1 = arith.constant 0 : i32
    return %c0_i32, %arg0, %c0_i32_0 : i32, i32, i32
  }
  func.func @transform_1(%arg0: i32) -> (i32, i32, i32) {
    %c0_i32 = arith.constant 0 : i32
    %c0_i32_0 = arith.constant 0 : i32
    %c0_i32_1 = arith.constant 0 : i32
    %c0_i32_2 = arith.constant 0 : i32
    return %c0_i32, %c0_i32_0, %c0_i32_1 : i32, i32, i32
  }
  func.func @transform_2(%arg0: i32) -> (i32, i32) {
    %c0_i32 = arith.constant 0 : i32
    %c0_i32_0 = arith.constant 0 : i32
    %c0_i32_1 = arith.constant 0 : i32
    return %c0_i32, %c0_i32_0 : i32, i32
  }
  func.func @transform_3(%arg0: i32) -> (i32, i32) {
    %c0_i32 = arith.constant 0 : i32
    %c0_i32_0 = arith.constant 0 : i32
    %c0_i32_1 = arith.constant 0 : i32
    return %c0_i32, %c0_i32_0 : i32, i32
  }
  func.func @transform_4(%arg0: i32) -> (i32, i32) {
    %c0_i32 = arith.constant 0 : i32
    %c0_i32_0 = arith.constant 0 : i32
    %c0_i32_1 = arith.constant 0 : i32
    return %c0_i32, %c0_i32_0 : i32, i32
  }
  func.func @transform_5(%arg0: i32) -> (i32, i32) {
    %c0_i32 = arith.constant 0 : i32
    %c0_i32_0 = arith.constant 0 : i32
    return %arg0, %c0_i32 : i32, i32
  }
}

</mosaic_0001>

<bundles_post_ra>
// kernel: multilabel_mlp_forward.1
= control target key start
LH: loop header
LB: loop body
LE: loop exit
PB: predicated region body
PF: predicated region fallthrough
CT: control target
= control target key end

     0   :  { %vm48_vm0 = vcmask 261120   ;;  %s756_s0 = inlined_call_operand.vmem [shape: f32[8,2,32], index: 0, kind: input, shape index: {}]   ;;  %s757_s1 = inlined_call_operand.vmem [shape: bf16[8,32,128], index: 1, kind: input, shape index: {}]   ;;  %s758_s2 = inlined_call_operand.vmem [shape: f32[1,128], index: 2, kind: input, shape index: {}]   ;;  %s759_s3 = inlined_call_operand.vmem [shape: bf16[128,128], index: 3, kind: input, shape index: {}]   ;;  %s760_s4 = inlined_call_operand.vmem [shape: f32[1,128], index: 4, kind: input, shape index: {}]   ;;  %s761_s5 = inlined_call_operand.hbm [shape: f32[2,128], index: 5, kind: output, shape index: {}]  }
   0x1   :  { %v562_v0 = vld [vmem:[%s757_s1 + $0x18] sm:$0xff]  ;;  %v564_v1 = vld [vmem:[%s757_s1 + $0x28] sm:$0xff]  ;;  %v561_v2 = vld [vmem:[%s757_s1 + $0x10] sm:$0xff] }
   0x2   :  { %v566_v3 = vld [vmem:[%s757_s1 + $0x38] sm:$0xff]  ;;  %58 = vmatpush.bf16.msra.mxu1 %v562_v0  ;;  %122 = vmatpush.bf16.msra.mxu2 %v564_v1  ;;  %v420_v4 = vld [vmem:[%s756_s0 + $0x2] sm:$0x3]  ;;  %v443_v6 = vld [vmem:[%s756_s0 + $0x4] sm:$0x3] }
   0x3   :  { %v563_v5 = vld [vmem:[%s757_s1 + $0x20] sm:$0xff]  ;;  %159 = vmatpush.bf16.msra.mxu3 %v566_v3  ;;  %v560_v7 = vld [vmem:[%s757_s1 + $0x8] sm:$0xff]  ;;  %v565_v8 = vld [vmem:[%s757_s1 + $0x30] sm:$0xff]  ;;  %v30_v12 = vpack.c.bf16 %v420_v4, %v420_v4  ;;  %v95_v13 = vpack.c.bf16 %v443_v6, %v443_v6 }
   0x4   :  { %v457_v9 = vld [vmem:[%s756_s0 + $0x6] sm:$0x3]  ;;  %v572_v10 = vld [vmem:[%s757_s1 + $0x68] sm:$0xff]  ;;  %v574_v11 = vld [vmem:[%s757_s1 + $0x78] sm:$0xff] }
   0x5   :  { %v132_v14 = vpack.c.bf16 %v457_v9, %v457_v9  ;;  %v568_v15 = vld [vmem:[%s757_s1 + $0x48] sm:$0xff]  ;;  %v559_v16 = vld [vmem:[%s757_s1] sm:$0xff]  ;;  %v570_v17 = vld [vmem:[%s757_s1 + $0x58] sm:$0xff] }
   0x6   :  { %59 = vmatpush.bf16.msra.mxu1 %v561_v2  ;;  %123 = vmatpush.bf16.msra.mxu2 %v563_v5  ;;  %v571_v18 = vld [vmem:[%s757_s1 + $0x60] sm:$0xff] }
   0x7   :  { %160 = vmatpush.bf16.msra.mxu3 %v565_v8 }
   0xa   :  { %86 = vmatpush.bf16.msrb.mxu1 %v560_v7  ;;  %270 = vmatpush.bf16.msrb.mxu2 %v572_v10 }
   0xb   :  { %307 = vmatpush.bf16.msrb.mxu3 %v574_v11 }
   0xc   :  { %10 = vsyncpa [#allocation3], 0  ;;  %433 = vmatmul.msk.bf16.vlgmr.msra.gmra.mxu1 %vm48_vm0, %v30_v12  ;;  %456 = vmatmul.msk.bf16.vlgmr.msra.gmra.mxu2 %vm48_vm0, %v95_v13  ;;  %v573_v19 = vld [vmem:[%s757_s1 + $0x70] sm:$0xff]  ;;  %v567_v20 = vld [vmem:[%s757_s1 + $0x40] sm:$0xff]  ;;  %s612_s8 = smov [#allocation2]   ;;  %s411_s12 = sshll.u32 %s761_s5, 4  ;;  %s412_s12 = int_to_ptr.hbm [resolvable:$true] %s411_s12 }
   0xd   :  { %470 = vmatmul.msk.bf16.vlgmr.msra.gmra.mxu3 %vm48_vm0, %v132_v14  ;;  %196 = vmatpush.bf16.msra.mxu0 %v568_v15  ;;  %v471_v21 = vld [vmem:[%s756_s0 + $0x8] sm:$0x3]  ;;  %v569_v22 = vld [vmem:[%s757_s1 + $0x50] sm:$0xff]  ;;  %v22_v24 = vld [vmem:[%s756_s0] sm:$0x3]  ;;  %s409_s9 = sshll.u32 %s612_s8, 4  ;;  %s410_s9 = int_to_ptr.vmem [resolvable:$true] %s409_s9 }
   0xe   :  { %87 = vmatpush.bf16.msrb.mxu1 %v559_v16  ;;  %271 = vmatpush.bf16.msrb.mxu2 %v571_v18  ;;  %v169_v23 = vpack.c.bf16 %v471_v21, %v471_v21  ;;  %v499_v25 = vld [vmem:[%s756_s0 + $0xc] sm:$0x3]  ;;  %v513_v26 = vld [vmem:[%s756_s0 + $0xe] sm:$0x3]  ;;  %v23_v27 = vpack.c.bf16 %v22_v24, %v22_v24  ;;  %v485_v30 = vld [vmem:[%s756_s0 + $0xa] sm:$0x3] }
   0xf   :  { %308 = vmatpush.bf16.msrb.mxu3 %v573_v19  ;;  %v243_v28 = vpack.c.bf16 %v499_v25, %v499_v25  ;;  %v280_v29 = vpack.c.bf16 %v513_v26, %v513_v26  ;;  %v206_v31 = vpack.c.bf16 %v485_v30, %v485_v30  ;;  %v582_v32 = vld [vmem:[%s759_s3 + $0x38] sm:$0xff]  ;;  %v581_v33 = vld [vmem:[%s759_s3 + $0x30] sm:$0xff]  ;;  %v580_v34 = vld [vmem:[%s759_s3 + $0x28] sm:$0xff] }
  0x10   :  { %v579_v35 = vld [vmem:[%s759_s3 + $0x20] sm:$0xff]  ;;  %v578_v36 = vld [vmem:[%s759_s3 + $0x18] sm:$0xff]  ;;  %v577_v38 = vld [vmem:[%s759_s3 + $0x10] sm:$0xff] }
  0x11   :  { %197 = vmatpush.bf16.msra.mxu0 %v567_v20  ;;  %v576_v39 = vld [vmem:[%s759_s3 + $0x8] sm:$0xff]  ;;  %v575_v44 = vld [vmem:[%s759_s3] sm:$0xff] }
  0x12   :  { %233 = vmatpush.bf16.msra.mxu1 %v570_v17  ;;  %v584_v61 = vld [vmem:[%s758_s2] ss:$0 sm:$0xff] }
  0x13   :  { %v585_v3 = vld [vmem:[%s760_s4] ss:$0 sm:$0xff] }
  0x14   :  { %484 = vmatmul.msk.bf16.vlgmr.msra.gmra.mxu0 %vm48_vm0, %v169_v23 }
  0x15   :  { %390 = vmatpush.bf16.msrb.mxu0 %v582_v32 }
  0x16   :  { %234 = vmatpush.bf16.msra.mxu1 %v569_v22 }
  0x19   :  { %391 = vmatpush.bf16.msrb.mxu0 %v581_v33 }
  0x1c   :  { %442 = vmatmul.msk.bf16.vlgmr.msrb.gmra.mxu1 %vm48_vm0, %v23_v27  ;;  %512 = vmatmul.msk.bf16.vlgmr.msrb.gmra.mxu2 %vm48_vm0, %v243_v28 }
  0x1d   :  { %526 = vmatmul.msk.bf16.vlgmr.msrb.gmra.mxu3 %vm48_vm0, %v280_v29  ;;  %392 = vmatpush.bf16.msrb.mxu0 %v580_v34 }
  0x21   :  { %393 = vmatpush.bf16.msrb.mxu0 %v579_v35 }
  0x25   :  { %394 = vmatpush.bf16.msrb.mxu0 %v578_v36 }
  0x29   :  { %395 = vmatpush.bf16.msrb.mxu0 %v577_v38 }
  0x2c   :  { %498 = vmatmul.msk.bf16.vlgmr.msra.gmra.mxu1 %vm48_vm0, %v206_v31 }
  0x2d   :  { %396 = vmatpush.bf16.msrb.mxu0 %v576_v39 }
  0x31   :  { %397 = vmatpush.bf16.msrb.mxu0 %v575_v44 }
  0x89   :  { %v61_v37 = vpop.f32.mrf.mxu1 }
  0x8f   :  { %v125_v40 = vpop.f32.mrf.mxu2 }
  0x90   :  { %v162_v41 = vpop.f32.mrf.mxu3 }
  0x91   :  { %v63_v42 = vpop.f32.mrf.mxu1  ;;  %v199_v43 = vpop.f32.mrf.mxu0 }
  0x97   :  { %v127_v45 = vpop.f32.mrf.mxu2 }
  0x98   :  { %v164_v46 = vpop.f32.mrf.mxu3 }
  0x99   :  { %v89_v47 = vpop.f32.mrf.mxu1  ;;  %v201_v48 = vpop.f32.mrf.mxu0 }
  0x9a   :  { %v90_v49 = vadd.f32 %v89_v47, %v61_v37 }
  0x9c   :  { %v129_v51 = vadd.f32 %v125_v40, %v90_v49 }
  0x9e   :  { %v166_v54 = vadd.f32 %v162_v41, %v129_v51 }
  0x9f   :  { %v273_v50 = vpop.f32.mrf.mxu2 }
  0xa0   :  { %v310_v52 = vpop.f32.mrf.mxu3  ;;  %v203_v56 = vadd.f32 %v199_v43, %v166_v54 }
  0xa1   :  { %v91_v53 = vpop.f32.mrf.mxu1 }
  0xa7   :  { %v275_v55 = vpop.f32.mrf.mxu2 }
  0xa8   :  { %v312_v57 = vpop.f32.mrf.mxu3 }
  0xa9   :  { %v236_v58 = vpop.f32.mrf.mxu1 }
  0xaa   :  { %v240_v59 = vadd.f32 %v236_v58, %v203_v56 }
  0xac   :  { %v277_v60 = vadd.f32 %v273_v50, %v240_v59 }
  0xae   :  { %v314_v62 = vadd.f32 %v310_v52, %v277_v60 }
  0xb0   :  { %v319_v63 = vadd.f32 %v584_v61, %v314_v62 }
  0xb1   :  { %v238_v0 = vpop.f32.mrf.mxu1 }
  0xb2   :  { %v320_v1 = vmax.f32 %v319_v63, 0.0 }
  0xb4   :  { %v321_v2 = vpack.c.bf16 %v320_v1, %v320_v1 }
  0xb6   :  { %398 = vmatmul.bf16.vlgmr.msrb.gmra.mxu0 %v321_v2 }
 0x133   :  { %v399_v4 = vpop.f32.mrf.mxu0 }
 0x134   :  { %v400_v5 = vadd.f32 %v585_v3, %v399_v4 }
 0x136   :  { %403 = vst [vmem:[#allocation2] sm:$0x3] %v400_v5 }
 0x137   :  { %414 = dma.vmem_to_hbm [thread:$0]  %s410_s9, 32, %s412_s12, [#allocation3]  }
 0x13b   :  { %v401_v6 = vpop.f32.mrf.mxu0 }
 0x13c   :  { %610 = dma.done.wait [#allocation3], 32  }
 0x13d   :  { %611 = vsyncadd [#allocation3], 4294967264 }
 0x13e   :  { %419 = vsyncpa [#allocation3], 1 }

</bundles_post_ra>
